<compile_context>
chip_gen: v7x
topology: tpu7x:2x2x1
jax: 0.10.0
libtpu: 0.0.40
codegen_flags: <defaults>
</compile_context>

<pallas_src>
import functools

import jax
import jax.numpy as jnp
from jax.experimental import pallas as pl
from jax.experimental.pallas import tpu as pltpu

REPARAM_NOISE = 1e-6
MAX_LOG_STD = 2.0
OUT_LANES = 8          # output slab lanes: lane 0 = mu, lane 1 = log_std
MAX_TB = 2048          # max batch-tile rows (review: 1024-2048)


def _round_up(n, m):
    return ((n + m - 1) // m) * m


# ---------------------------------------------------------------------------
# Kernel: one batch tile per grid step; all params resident in VMEM.
#
# Packed-parameter row layout (sections 8-row aligned, L = lane width =
# round_up(hidden_dim, 8); columns >= hidden_dim are zero):
#   [0,        s_pad)   W1      (state_dim live rows)
#   [s_pad,    +8)      b1      (row 0 of the section)
#   [..,       +L)      W2
#   [..,       +8)      b2
#   [..,       +L)      W_head  (lane 0 = mu, lane 1 = log_std, rest zero)
#   [..,       +8)      b_head  (row 0)
# ---------------------------------------------------------------------------
def actor_kernel(x_ref, p_ref, out_ref, *, state_dim, s_pad):
    L = p_ref.shape[1]
    o_b1 = s_pad
    o_w2 = o_b1 + 8
    o_b2 = o_w2 + L
    o_wh = o_b2 + 8
    o_bh = o_wh + L
    wdt = p_ref.dtype            # matmul input dtype (bf16 in default packing)
    f32 = jnp.float32

    x = x_ref[...].astype(wdt)                        # (TB, state_dim)
    w1 = p_ref[0:state_dim, :]                        # (state_dim, L)
    b1 = p_ref[o_b1:o_b1 + 1, :].astype(f32)          # (1, L)
    w2 = p_ref[o_w2:o_w2 + L, :]                      # (L, L)
    b2 = p_ref[o_b2:o_b2 + 1, :].astype(f32)
    wh = p_ref[o_wh:o_wh + L, :]                      # (L, L), 2 live lanes
    bh = p_ref[o_bh:o_bh + 1, :].astype(f32)

    h1 = jnp.maximum(jnp.dot(x, w1, preferred_element_type=f32) + b1, 0.0)
    h2 = jnp.maximum(
        jnp.dot(h1.astype(wdt), w2, preferred_element_type=f32) + b2, 0.0)
    y = jnp.dot(h2.astype(wdt), wh, preferred_element_type=f32) + bh  # (TB, L)

    # Narrow to 8 lanes: lane 0 = mu (unclamped), lane 1 = log_std (clamped).
    y8 = y[:, :OUT_LANES]
    lane = jax.lax.broadcasted_iota(jnp.int32, y8.shape, 1)
    out_ref[...] = jnp.where(lane == 1,
                             jnp.clip(y8, REPARAM_NOISE, MAX_LOG_STD),
                             y8)


# ---------------------------------------------------------------------------
# Parameter packing: one (rows, round_up(hidden, 8)) buffer, bf16 by default.
# ---------------------------------------------------------------------------
def pack_params(p, state_dim, hidden_dim, dtype=jnp.bfloat16):
    L = _round_up(hidden_dim, 8)
    s_pad = _round_up(state_dim, 8)
    o_b1 = s_pad
    o_w2 = o_b1 + 8
    o_b2 = o_w2 + L
    o_wh = o_b2 + 8
    o_bh = o_wh + L
    rows = o_bh + 8

    buf = jnp.zeros((rows, L), jnp.float32)
    buf = buf.at[0:state_dim, :hidden_dim].set(p["w1"])
    buf = buf.at[o_b1, :hidden_dim].set(p["b1"].reshape(-1))
    buf = buf.at[o_w2:o_w2 + hidden_dim, :hidden_dim].set(p["w2"])
    buf = buf.at[o_b2, :hidden_dim].set(p["b2"].reshape(-1))
    wh = jnp.concatenate([p["wmu"], p["wls"]], axis=1)            # (hidden, 2)
    bh = jnp.concatenate([p["bmu"], p["bls"]], axis=1)            # (1, 2)
    buf = buf.at[o_wh:o_wh + hidden_dim, :2].set(wh)
    buf = buf.at[o_bh, :2].set(bh.reshape(-1))
    return buf.astype(dtype)


# ---------------------------------------------------------------------------
# Wrapper: batch-parallel grid, no input padding, narrow (B, 8) output slab.
# ---------------------------------------------------------------------------
@jax.jit
def actor_forward(x, packed):
    B, state_dim = x.shape
    rows, L = packed.shape
    s_pad = _round_up(state_dim, 8)
    assert rows == s_pad + 2 * L + 24, "packed params do not match x's state_dim"

    # Batch tiling:
    #   * whole batch in one tile when it fits (kills per-grid-step overhead),
    #   * else an even number of ~equal 8-aligned tiles so the parallel axis
    #     splits evenly across v7x's two TensorCores.
    # Pallas masks the partial last block; garbage rows are safe because the
    # kernel never reduces across rows.
    if B <= MAX_TB:
        tb = B
    else:
        n = pl.cdiv(B, MAX_TB)
        n += n % 2
        tb = _round_up(pl.cdiv(B, n), 8)
    grid = pl.cdiv(B, tb)

    out = pl.pallas_call(
        functools.partial(actor_kernel, state_dim=state_dim, s_pad=s_pad),
        out_shape=jax.ShapeDtypeStruct((B, OUT_LANES), jnp.float32),
        grid=(grid,),
        in_specs=[
            pl.BlockSpec((tb, state_dim), lambda i: (i, 0)),   # x tile
            pl.BlockSpec((rows, L), lambda i: (0, 0)),         # params, resident
        ],
        out_specs=pl.BlockSpec((tb, OUT_LANES), lambda i: (i, 0)),
        compiler_params=pltpu.CompilerParams(
            dimension_semantics=("parallel",)),
    )(x, packed)

    mu = out[:, 0:1]
    log_std = out[:, 1:2]
    return mu, log_std


# ---------------------------------------------------------------------------
# Reference / init (weights stored (in, out) so forward is x @ W)
# ---------------------------------------------------------------------------
def init_params(key, state_dim, hidden_dim):
    ks = jax.random.split(key, 8)
    s1 = 1.0 / jnp.sqrt(state_dim)
    s2 = 1.0 / jnp.sqrt(hidden_dim)
    return {
        "w1":  jax.random.uniform(ks[0], (state_dim, hidden_dim), jnp.float32, -s1, s1),
        "b1":  jax.random.uniform(ks[1], (1, hidden_dim), jnp.float32, -s1, s1),
        "w2":  jax.random.uniform(ks[2], (hidden_dim, hidden_dim), jnp.float32, -s2, s2),
        "b2":  jax.random.uniform(ks[3], (1, hidden_dim), jnp.float32, -s2, s2),
        "wmu": jax.random.uniform(ks[4], (hidden_dim, 1), jnp.float32, -s2, s2),
        "bmu": jax.random.uniform(ks[5], (1, 1), jnp.float32, -s2, s2),
        "wls": jax.random.uniform(ks[6], (hidden_dim, 1), jnp.float32, -s2, s2),
        "bls": jax.random.uniform(ks[7], (1, 1), jnp.float32, -s2, s2),
    }


def reference_forward(x, p):
    h1 = jnp.maximum(x @ p["w1"] + p["b1"], 0.0)
    h2 = jnp.maximum(h1 @ p["w2"] + p["b2"], 0.0)
    mu = h2 @ p["wmu"] + p["bmu"]
    ls = jnp.clip(h2 @ p["wls"] + p["bls"], REPARAM_NOISE, MAX_LOG_STD)
    return mu, ls


if __name__ == "__main__":
    B, STATE_DIM, HIDDEN = 8, 16, 32
    key = jax.random.PRNGKey(0)
    k_x, k_p = jax.random.split(key)
    x = jax.random.normal(k_x, (B, STATE_DIM), jnp.float32)
    params = init_params(k_p, STATE_DIM, HIDDEN)
    mu_ref, ls_ref = reference_forward(x, params)

    # 1) exact-precision (f32) packing: tight check of the kernel math
    packed_f32 = pack_params(params, STATE_DIM, HIDDEN, dtype=jnp.float32)
    mu, log_std = actor_forward(x, packed_f32)
    jax.block_until_ready((mu, log_std))
    assert mu.shape == (B, 1) and log_std.shape == (B, 1)
    assert jnp.allclose(mu, mu_ref, atol=1e-5, rtol=1e-5)
    assert jnp.allclose(log_std, ls_ref, atol=1e-5, rtol=1e-5)

    # 2) default bf16-weight packing (MXU-friendly on v6e/v7x): loose tolerance
    packed_bf16 = pack_params(params, STATE_DIM, HIDDEN)          # bf16
    mu_b, ls_b = actor_forward(x, packed_bf16)
    jax.block_until_ready((mu_b, ls_b))
    assert jnp.allclose(mu_b, mu_ref, atol=3e-2, rtol=3e-2)
    assert jnp.allclose(ls_b, ls_ref, atol=3e-2, rtol=3e-2)

    # 3) large batch: multi-tile even grid + masked partial last block
    B2 = 4100
    x2 = jax.random.normal(jax.random.PRNGKey(1), (B2, STATE_DIM), jnp.float32)
    mu2, ls2 = actor_forward(x2, packed_f32)
    jax.block_until_ready((mu2, ls2))
    mu2_ref, ls2_ref = reference_forward(x2, params)
    assert jnp.allclose(mu2, mu2_ref, atol=1e-5, rtol=1e-5)
    assert jnp.allclose(ls2, ls2_ref, atol=1e-5, rtol=1e-5)

    print("KERNEL_OK")
</pallas_src>

<mosaic_0001>
module attributes {stable_mosaic.version = 11 : i64} {
  func.func @actor_kernel(%arg0: i32, %arg1: memref<8x16xf32, #tpu.memory_space<vmem>>, %arg2: memref<104x32xf32, #tpu.memory_space<vmem>>, %arg3: memref<8x8xf32, #tpu.memory_space<vmem>>) attributes {dimension_semantics = [#tpu.dimension_semantics<parallel>], iteration_bounds = array<i64: 1>, scalar_prefetch = 0 : i64, scratch_operands = 0 : i64, tpu.core_type = #tpu.core_type<tc>, window_params = [{transform_indices = @transform_0, window_bounds = array<i64: 8, 16>}, {pipeline_mode = #tpu.pipeline_mode<synchronous>, transform_indices = @transform_1, window_bounds = array<i64: 104, 32>}, {transform_indices = @transform_2, window_bounds = array<i64: 8, 8>}]} {
    %c0 = arith.constant 0 : index
    %c0_0 = arith.constant 0 : index
    %0 = vector.load %arg1[%c0, %c0_0] : memref<8x16xf32, #tpu.memory_space<vmem>>, vector<8x16xf32>
    %c0_1 = arith.constant 0 : index
    %c0_2 = arith.constant 0 : index
    %1 = vector.load %arg2[%c0_1, %c0_2] : memref<104x32xf32, #tpu.memory_space<vmem>>, vector<16x32xf32>
    %c16 = arith.constant 16 : index
    %c0_3 = arith.constant 0 : index
    %2 = vector.load %arg2[%c16, %c0_3] : memref<104x32xf32, #tpu.memory_space<vmem>>, vector<1x32xf32>
    %c24 = arith.constant 24 : index
    %c0_4 = arith.constant 0 : index
    %3 = vector.load %arg2[%c24, %c0_4] : memref<104x32xf32, #tpu.memory_space<vmem>>, vector<32x32xf32>
    %c56 = arith.constant 56 : index
    %c0_5 = arith.constant 0 : index
    %4 = vector.load %arg2[%c56, %c0_5] : memref<104x32xf32, #tpu.memory_space<vmem>>, vector<1x32xf32>
    %c64 = arith.constant 64 : index
    %c0_6 = arith.constant 0 : index
    %5 = vector.load %arg2[%c64, %c0_6] : memref<104x32xf32, #tpu.memory_space<vmem>>, vector<32x32xf32>
    %c96 = arith.constant 96 : index
    %c0_7 = arith.constant 0 : index
    %6 = vector.load %arg2[%c96, %c0_7] : memref<104x32xf32, #tpu.memory_space<vmem>>, vector<1x32xf32>
    %cst = arith.constant dense<0.000000e+00> : vector<8x32xf32>
    %7 = tpu.matmul %0, %1, %cst {dimension_numbers = #tpu.dot_dimension_numbers<[1], [0], [0], [1], [0, 0, 1, 1], [], []>} : vector<8x16xf32>, vector<16x32xf32>, vector<8x32xf32> -> vector<8x32xf32>
    %8 = vector.broadcast %2 : vector<1x32xf32> to vector<8x32xf32>
    %9 = arith.addf %7, %8 : vector<8x32xf32>
    %cst_8 = arith.constant 0.000000e+00 : f32
    %10 = vector.broadcast %cst_8 : f32 to vector<8x32xf32>
    %11 = arith.maximumf %9, %10 : vector<8x32xf32>
    %cst_9 = arith.constant dense<0.000000e+00> : vector<8x32xf32>
    %12 = tpu.matmul %11, %3, %cst_9 {dimension_numbers = #tpu.dot_dimension_numbers<[1], [0], [0], [1], [0, 0, 1, 1], [], []>} : vector<8x32xf32>, vector<32x32xf32>, vector<8x32xf32> -> vector<8x32xf32>
    %13 = vector.broadcast %4 : vector<1x32xf32> to vector<8x32xf32>
    %14 = arith.addf %12, %13 : vector<8x32xf32>
    %cst_10 = arith.constant 0.000000e+00 : f32
    %15 = vector.broadcast %cst_10 : f32 to vector<8x32xf32>
    %16 = arith.maximumf %14, %15 : vector<8x32xf32>
    %cst_11 = arith.constant dense<0.000000e+00> : vector<8x32xf32>
    %17 = tpu.matmul %16, %5, %cst_11 {dimension_numbers = #tpu.dot_dimension_numbers<[1], [0], [0], [1], [0, 0, 1, 1], [], []>} : vector<8x32xf32>, vector<32x32xf32>, vector<8x32xf32> -> vector<8x32xf32>
    %18 = vector.broadcast %6 : vector<1x32xf32> to vector<8x32xf32>
    %19 = arith.addf %17, %18 : vector<8x32xf32>
    %20 = vector.extract_strided_slice %19 {offsets = [0, 0], sizes = [8, 8], strides = [1, 1]} : vector<8x32xf32> to vector<8x8xf32>
    %21 = tpu.iota {dimensions = array<i32: 1>} : vector<8x8xi32>
    %c1_i32 = arith.constant 1 : i32
    %22 = vector.broadcast %c1_i32 : i32 to vector<8x8xi32>
    %23 = arith.cmpi eq, %21, %22 : vector<8x8xi32>
    %cst_12 = arith.constant 9.99999997E-7 : f32
    %cst_13 = arith.constant 2.000000e+00 : f32
    %24 = vector.broadcast %cst_12 : f32 to vector<8x8xf32>
    %25 = arith.maximumf %24, %20 : vector<8x8xf32>
    %26 = vector.broadcast %cst_13 : f32 to vector<8x8xf32>
    %27 = arith.minimumf %26, %25 : vector<8x8xf32>
    %28 = arith.select %23, %27, %20 : vector<8x8xi1>, vector<8x8xf32>
    %c0_14 = arith.constant 0 : index
    %c0_15 = arith.constant 0 : index
    %29 = vector.load %arg3[%c0_14, %c0_15] : memref<8x8xf32, #tpu.memory_space<vmem>>, vector<8x8xf32>
    tpu.vector_store %arg3[%c0_14, %c0_15], %28 {strides = array<i32>} : memref<8x8xf32, #tpu.memory_space<vmem>>, vector<8x8xf32>,
    return
  }
  func.func @transform_0(%arg0: i32) -> (i32, i32) {
    %c0_i32 = arith.constant 0 : i32
    %c0_i32_0 = arith.constant 0 : i32
    return %arg0, %c0_i32 : i32, i32
  }
  func.func @transform_1(%arg0: i32) -> (i32, i32) {
    %c0_i32 = arith.constant 0 : i32
    %c0_i32_0 = arith.constant 0 : i32
    %c0_i32_1 = arith.constant 0 : i32
    return %c0_i32, %c0_i32_0 : i32, i32
  }
  func.func @transform_2(%arg0: i32) -> (i32, i32) {
    %c0_i32 = arith.constant 0 : i32
    %c0_i32_0 = arith.constant 0 : i32
    return %arg0, %c0_i32 : i32, i32
  }
}

</mosaic_0001>

<bundles_post_ra>
// kernel: actor_forward.1
= control target key start
LH: loop header
LB: loop body
LE: loop exit
PB: predicated region body
PF: predicated region fallthrough
CT: control target
= control target key end

     0   :  { %v338_v0 = vmov 0.0|0.0   ;;  %vm339_vm0 = vmmov 0   ;;  %v340_v3 = vmov 0.0   ;;  %vm29_vm1 = vcmask 130048   ;;  %s404_s1 = inlined_call_operand.vmem [shape: f32[104,32], index: 1, kind: input, shape index: {}]   ;;  %s405_s0 = inlined_call_operand.vmem [shape: f32[8,16], index: 0, kind: input, shape index: {}]   ;;  %s406_s2 = inlined_call_operand.vmem [shape: f32[8,8], index: 2, kind: output, shape index: {}]  }
   0x1   :  { %320 = vmatprep.subr.bf16.mxu0 %v338_v0  ;;  %v12_v1 = vld [vmem:[%s404_s1] sm:$0xff]  ;;  %v13_v2 = vld [vmem:[%s404_s1 + $0x8] sm:$0xff]  ;;  %295 = vmatprep.mubr.msk.f32.mxu0 %vm339_vm0, %v340_v3  ;;  %v15_v5 = vld [vmem:[%s404_s1 + $0x18] sm:$0xff]  ;;  %vm108_vm2 = vcmask 261120   ;;  %v260_v28 = vlaneseq  ;;  %vm266_vm4 = vcmask 64512  }
   0x2   :  { %v321_v4 = vpack.c.bf16 %v13_v2, %v12_v1  ;;  %323 = vmatprep.subr.bf16.mxu1 %v338_v0  ;;  %v16_v6 = vld [vmem:[%s404_s1 + $0x20] sm:$0xff]  ;;  %306 = vmatprep.mubr.msk.f32.mxu1 %vm339_vm0, %v340_v3  ;;  %v17_v9 = vld [vmem:[%s404_s1 + $0x28] sm:$0xff]  ;;  %v18_v10 = vld [vmem:[%s404_s1 + $0x30] sm:$0xff] }
   0x3   :  { %v324_v7 = vpack.c.bf16 %v16_v6, %v15_v5  ;;  %v11_v8 = vld [vmem:[%s405_s0] sm:$0xff]  ;;  %v327_v11 = vpack.c.bf16 %v18_v10, %v17_v9  ;;  %v21_v13 = vld [vmem:[%s404_s1 + $0x48] sm:$0xff]  ;;  %v272_v15 = vld [vmem:[%s404_s1 + $0x10] ss:$0 sm:$0xff]  ;;  %v261_v31 = vand.u32 127, %v260_v28 }
   0x4   :  { %322 = vmatpush3.bf16.msra.mxu0 %v321_v4  ;;  %v20_v12 = vld [vmem:[%s404_s1 + $0x40] sm:$0xff]  ;;  %v22_v20 = vld [vmem:[%s404_s1 + $0x50] sm:$0xff]  ;;  %v23_v21 = vld [vmem:[%s404_s1 + $0x58] sm:$0xff] }
   0x5   :  { %325 = vmatpush3.bf16.msra.mxu1 %v324_v7  ;;  %329 = vmatprep.subr.bf16.mxu0 %v338_v0  ;;  %v330_v14 = vpack.c.bf16 %v21_v13, %v20_v12  ;;  %v333_v22 = vpack.c.bf16 %v23_v21, %v22_v20  ;;  %v274_v23 = vld [vmem:[%s404_s1 + $0x38] ss:$0 sm:$0xff]  ;;  %v276_v29 = vld [vmem:[%s404_s1 + $0x60] ss:$0 sm:$0xff]  ;;  %vm262_vm3 = vcmp.eq.s32.totalorder %v261_v31, 1 }
   0x6   :  { %326 = vmatprep.subr.bf16.mxu1 %v338_v0 }
   0x7   :  { %296 = vmatmul.mubr.msk.f32.vlgmr.msra.gmra.mrb[0].mxu0 %vm29_vm1, %v11_v8 }
   0x8   :  { %317 = vmatprep.mubr.msk.f32.mxu0 %vm339_vm0, %v340_v3  ;;  %331 = vmatpush3.bf16.msra.mxu0 %v330_v14 }
   0x9   :  { %328 = vmatpush3.bf16.msra.mxu1 %v327_v11  ;;  %332 = vmatprep.subr.bf16.mxu0 %v338_v0 }
   0xc   :  { %334 = vmatpush3.bf16.msra.mxu0 %v333_v22 }
  0xda   :  { %v99_v16 = vpop.f32.mrb[0].mxu0 }
  0xdb   :  { %v100_v17 = vadd.f32 %v272_v15, %v99_v16  ;;  %v297_v18 = vpop.f32.mrb[1].mxu0 }
  0xdd   :  { %v103_v19 = vmax.f32 %v100_v17, 0.0 }
  0xdf   :  { %307 = vmatmul.mubr.msk.f32.vlgmr.msra.gmra.mrb[0].mxu1 %vm108_vm2, %v103_v19 }
 0x1b2   :  { %v178_v24 = vpop.f32.mrb[0].mxu1 }
 0x1b3   :  { %v179_v25 = vadd.f32 %v274_v23, %v178_v24  ;;  %v308_v26 = vpop.f32.mrb[1].mxu1 }
 0x1b5   :  { %v182_v27 = vmax.f32 %v179_v25, 0.0 }
 0x1b7   :  { %318 = vmatmul.mubr.msk.f32.vlgmr.msra.gmra.mrb[2].mxu0 %vm108_vm2, %v182_v27 }
 0x28a   :  { %v256_v30 = vpop.f32.mrb[2].mxu0 }
 0x28b   :  { %v257_v32 = vadd.f32 %v276_v29, %v256_v30  ;;  %v319_v33 = vpop.f32.mrb[3].mxu0 }
 0x28d   :  { %v263_v34 = vmax.f32 %v257_v32, 1e-06 }
 0x28f   :  { %v264_v35 = vmin.f32 %v263_v34, 2.0 }
 0x291   :  { %v265_v36 = vsel %vm262_vm3, %v264_v35, %v257_v32 }
 0x292   :  { %267 = vst.msk [vmem:[%s406_s2] sm:$0xff] %vm266_vm4, %v265_v36 }

</bundles_post_ra>
